<compile_context>
chip_gen: v7x
topology: tpu7x:2x2x1
jax: 0.10.0
libtpu: 0.0.40
codegen_flags: <defaults>
</compile_context>

<pallas_src>
import functools

import jax
import jax.numpy as jnp
from jax import lax
from jax.experimental import pallas as pl
from jax.experimental.pallas import tpu as pltpu


def mhsa_kernel(xq_ref, xkv_ref, wq_ref, wkv_ref, wp_ref, bp_ref, o_ref, *,
                num_heads, causal):
    xq = xq_ref[0]                 # (TQ, C) query rows of this tile
    xkv = xkv_ref[0]               # (S,  C) full sequence (keys/values source)
    tq, c = xq.shape
    s = xkv.shape[0]
    hsz = c // num_heads
    dt = xq.dtype                  # MXU operand dtype (bf16-friendly; no-op for f32)

    # Fused projections. The 1/sqrt(embed_size) attention scale is pre-folded into wq_ref.
    q = jnp.dot(xq, wq_ref[...], preferred_element_type=jnp.float32)      # (TQ, C)
    kv = jnp.dot(xkv, wkv_ref[...], preferred_element_type=jnp.float32)   # (S, 2C)
    k = kv[:, :c]                                                          # (S, C)
    v = kv[:, c:]                                                          # (S, C)

    if causal:
        q_pos = pl.program_id(1) * tq + lax.broadcasted_iota(jnp.int32, (tq, s), 0)
        k_pos = lax.broadcasted_iota(jnp.int32, (tq, s), 1)
        allowed = k_pos <= q_pos                                           # (TQ, S)

    wp = wp_ref[...]                                                       # (C, C)
    acc = jnp.zeros((tq, c), dtype=jnp.float32)
    for head in range(num_heads):
        lo, hi = head * hsz, (head + 1) * hsz
        qh = q[:, lo:hi]                                                   # (TQ, H)
        kh = k[:, lo:hi]                                                   # (S,  H)
        vh = v[:, lo:hi]                                                   # (S,  H)

        # scores = qh @ kh^T without materializing kh.T (contract last dims)
        scores = lax.dot_general(qh, kh, (((1,), (1,)), ((), ())),
                                 preferred_element_type=jnp.float32)       # (TQ, S)
        if causal:
            scores = jnp.where(allowed, scores, -1e30)

        # numerically stable softmax, kept in f32 (v5e has no bf16 VPU/EUP path)
        m = jnp.max(scores, axis=-1, keepdims=True)
        e = jnp.exp(scores - m)
        denom = jnp.sum(e, axis=-1, keepdims=True)
        p = e * pl.reciprocal(denom, approx=True)                          # (TQ, S)
        # TODO(synk): attn_dropout / resid_dropout are identity in eval mode;
        #             training-time dropout is not implemented.

        oh = jnp.dot(p.astype(dt), vh.astype(dt),
                     preferred_element_type=jnp.float32)                   # (TQ, H)
        # concat-of-heads @ Wp^T  ==  sum over heads of  o_h @ Wp^T[head-row-block]
        acc = acc + jnp.dot(oh.astype(dt), wp[lo:hi, :],
                            preferred_element_type=jnp.float32)            # (TQ, C)

    out = acc + bp_ref[...]                                                # + bias (1, C)
    o_ref[0] = out.astype(o_ref.dtype)


def _pick_q_tile(seq_len):
    for cand in (256, 128, 64, 32, 16, 8):
        if seq_len >= cand and seq_len % cand == 0:
            return cand
    return seq_len


def multi_head_self_attention(x, wq_t, wk_t, wv_t, wp_t, bp, *, num_heads,
                              causal=True, q_tile=None):
    """x: (B, T, C).  wq_t/wk_t/wv_t/wp_t: (C, C) transposed Linear weights
    (q/k/v column block h*H:(h+1)*H belongs to head h).  bp: (C,) projection bias."""
    b, t, c = x.shape
    assert c % num_heads == 0
    if q_tile is None:
        q_tile = _pick_q_tile(t)
    assert t % q_tile == 0
    n_q = t // q_tile

    # Fold the 1/sqrt(embed_size) score scale into the Q weight (free at runtime,
    # removes a (TQ, S)-sized VPU multiply per head per tile).
    scale = 1.0 / float(c) ** 0.5
    wq_scaled = (wq_t * scale).astype(wq_t.dtype)
    # Fuse K and V projections into one (C, 2C) matmul: wider MXU N-dim, one DMA.
    wkv = jnp.concatenate([wk_t, wv_t], axis=-1)
    bp2 = bp.reshape(1, c)

    kernel = functools.partial(mhsa_kernel, num_heads=num_heads, causal=causal)

    return pl.pallas_call(
        kernel,
        out_shape=jax.ShapeDtypeStruct((b, t, c), x.dtype),
        grid_spec=pltpu.PrefetchScalarGridSpec(
            num_scalar_prefetch=0,
            grid=(b, n_q),
            in_specs=[
                pl.BlockSpec((1, q_tile, c), lambda bi, qi: (bi, qi, 0)),  # x (query tile)
                pl.BlockSpec((1, t, c), lambda bi, qi: (bi, 0, 0)),        # x (full seq, K/V)
                pl.BlockSpec((c, c), lambda bi, qi: (0, 0)),               # wq (pre-scaled)
                pl.BlockSpec((c, 2 * c), lambda bi, qi: (0, 0)),           # wk|wv fused
                pl.BlockSpec((c, c), lambda bi, qi: (0, 0)),               # wp
                pl.BlockSpec((1, c), lambda bi, qi: (0, 0)),               # bias
            ],
            out_specs=pl.BlockSpec((1, q_tile, c), lambda bi, qi: (bi, qi, 0)),
        ),
        compiler_params=pltpu.CompilerParams(
            dimension_semantics=("parallel", "parallel"),
            vmem_limit_bytes=32 * 1024 * 1024,
        ),
    )(x, x, wq_scaled, wkv, wp_t, bp2)


def reference(x, wq_t, wk_t, wv_t, wp_t, bp, *, num_heads, causal):
    """Pure-JAX mirror of the PyTorch MultiHeadSelfAttention forward (eval mode)."""
    b, t, c = x.shape
    hsz = c // num_heads
    q = x @ wq_t
    k = x @ wk_t
    v = x @ wv_t
    outs = []
    for head in range(num_heads):
        lo, hi = head * hsz, (head + 1) * hsz
        w = jnp.einsum("btd,bsd->bts", q[..., lo:hi], k[..., lo:hi]) / float(c) ** 0.5
        if causal:
            tril = jnp.tril(jnp.ones((t, t), dtype=bool))
            w = jnp.where(tril[None], w, -jnp.inf)
        w = jax.nn.softmax(w, axis=-1)
        outs.append(jnp.einsum("bts,bsd->btd", w, v[..., lo:hi]))
    att = jnp.concatenate(outs, axis=-1)
    return att @ wp_t + bp


if __name__ == "__main__":
    B, T, C, NUM_HEADS = 2, 8, 32, 4   # batch, seq (=ctx_length), embed_size, num_heads -> head_size=8

    key = jax.random.PRNGKey(0)
    kx, kq, kk, kv, kp, kb = jax.random.split(key, 6)
    x = jax.random.normal(kx, (B, T, C), dtype=jnp.float32)

    # nn.Linear(embed, head, bias=False) weights of all heads, stored transposed and
    # concatenated along columns (column block h*H:(h+1)*H == head h), matching torch.cat order.
    bound = 1.0 / float(C) ** 0.5
    wq_t = jax.random.uniform(kq, (C, C), jnp.float32, -bound, bound)
    wk_t = jax.random.uniform(kk, (C, C), jnp.float32, -bound, bound)
    wv_t = jax.random.uniform(kv, (C, C), jnp.float32, -bound, bound)
    # output projection nn.Linear(C, C) with bias
    wp_t = jax.random.uniform(kp, (C, C), jnp.float32, -bound, bound)
    bp = jax.random.uniform(kb, (C,), jnp.float32, -bound, bound)

    for causal in (True, False):   # module's `mask` flag
        out = multi_head_self_attention(x, wq_t, wk_t, wv_t, wp_t, bp,
                                        num_heads=NUM_HEADS, causal=causal)
        out = jax.block_until_ready(out)
        ref = reference(x, wq_t, wk_t, wv_t, wp_t, bp,
                        num_heads=NUM_HEADS, causal=causal)
        assert out.shape == (B, T, C)
        # approx=True reciprocal -> slightly looser tolerance than exact divide
        assert jnp.allclose(out, ref, atol=2e-3, rtol=2e-3), f"mismatch vs reference (causal={causal})"

    print("KERNEL_OK")
</pallas_src>

<mosaic_0001>
module attributes {stable_mosaic.version = 11 : i64} {
  func.func @mhsa_kernel(%arg0: i32, %arg1: i32, %arg2: memref<1x8x32xf32, #tpu.memory_space<vmem>>, %arg3: memref<1x8x32xf32, #tpu.memory_space<vmem>>, %arg4: memref<32x32xf32, #tpu.memory_space<vmem>>, %arg5: memref<32x64xf32, #tpu.memory_space<vmem>>, %arg6: memref<32x32xf32, #tpu.memory_space<vmem>>, %arg7: memref<1x32xf32, #tpu.memory_space<vmem>>, %arg8: memref<1x8x32xf32, #tpu.memory_space<vmem>>) attributes {dimension_semantics = [#tpu.dimension_semantics<parallel>, #tpu.dimension_semantics<parallel>], iteration_bounds = array<i64: 2, 1>, scalar_prefetch = 0 : i64, scratch_operands = 0 : i64, tpu.core_type = #tpu.core_type<tc>, window_params = [{transform_indices = @transform_0, window_bounds = array<i64: 1, 8, 32>}, {transform_indices = @transform_1, window_bounds = array<i64: 1, 8, 32>}, {pipeline_mode = #tpu.pipeline_mode<synchronous>, transform_indices = @transform_2, window_bounds = array<i64: 32, 32>}, {pipeline_mode = #tpu.pipeline_mode<synchronous>, transform_indices = @transform_3, window_bounds = array<i64: 32, 64>}, {pipeline_mode = #tpu.pipeline_mode<synchronous>, transform_indices = @transform_4, window_bounds = array<i64: 32, 32>}, {pipeline_mode = #tpu.pipeline_mode<synchronous>, transform_indices = @transform_5, window_bounds = array<i64: 1, 32>}, {transform_indices = @transform_6, window_bounds = array<i64: 1, 8, 32>}]} {
    %c0 = arith.constant 0 : index
    %c0_0 = arith.constant 0 : index
    %c0_1 = arith.constant 0 : index
    %0 = vector.load %arg2[%c0, %c0_0, %c0_1] : memref<1x8x32xf32, #tpu.memory_space<vmem>>, vector<1x8x32xf32>
    %1 = vector.shape_cast %0 : vector<1x8x32xf32> to vector<8x32xf32>
    %c0_2 = arith.constant 0 : index
    %c0_3 = arith.constant 0 : index
    %c0_4 = arith.constant 0 : index
    %2 = vector.load %arg3[%c0_2, %c0_3, %c0_4] : memref<1x8x32xf32, #tpu.memory_space<vmem>>, vector<1x8x32xf32>
    %3 = vector.shape_cast %2 : vector<1x8x32xf32> to vector<8x32xf32>
    %c0_5 = arith.constant 0 : index
    %c0_6 = arith.constant 0 : index
    %4 = vector.load %arg4[%c0_5, %c0_6] : memref<32x32xf32, #tpu.memory_space<vmem>>, vector<32x32xf32>
    %cst = arith.constant dense<0.000000e+00> : vector<8x32xf32>
    %5 = tpu.matmul %1, %4, %cst {dimension_numbers = #tpu.dot_dimension_numbers<[1], [0], [0], [1], [0, 0, 1, 1], [], []>} : vector<8x32xf32>, vector<32x32xf32>, vector<8x32xf32> -> vector<8x32xf32>
    %c0_7 = arith.constant 0 : index
    %c0_8 = arith.constant 0 : index
    %6 = vector.load %arg5[%c0_7, %c0_8] : memref<32x64xf32, #tpu.memory_space<vmem>>, vector<32x64xf32>
    %cst_9 = arith.constant dense<0.000000e+00> : vector<8x64xf32>
    %7 = tpu.matmul %3, %6, %cst_9 {dimension_numbers = #tpu.dot_dimension_numbers<[1], [0], [0], [1], [0, 0, 1, 1], [], []>} : vector<8x32xf32>, vector<32x64xf32>, vector<8x64xf32> -> vector<8x64xf32>
    %8 = vector.extract_strided_slice %7 {offsets = [0, 0], sizes = [8, 32], strides = [1, 1]} : vector<8x64xf32> to vector<8x32xf32>
    %9 = vector.extract_strided_slice %7 {offsets = [0, 32], sizes = [8, 32], strides = [1, 1]} : vector<8x64xf32> to vector<8x32xf32>
    %c8_i32 = arith.constant 8 : i32
    %10 = arith.muli %arg1, %c8_i32 : i32
    %11 = tpu.iota {dimensions = array<i32: 0>} : vector<8x8xi32>
    %12 = vector.broadcast %10 : i32 to vector<8x8xi32>
    %13 = arith.addi %12, %11 : vector<8x8xi32>
    %14 = tpu.iota {dimensions = array<i32: 1>} : vector<8x8xi32>
    %15 = arith.cmpi sle, %14, %13 : vector<8x8xi32>
    %c0_10 = arith.constant 0 : index
    %c0_11 = arith.constant 0 : index
    %16 = vector.load %arg6[%c0_10, %c0_11] : memref<32x32xf32, #tpu.memory_space<vmem>>, vector<32x32xf32>
    %cst_12 = arith.constant 0.000000e+00 : f32
    %17 = vector.broadcast %cst_12 : f32 to vector<8x32xf32>
    %18 = vector.extract_strided_slice %5 {offsets = [0, 0], sizes = [8, 8], strides = [1, 1]} : vector<8x32xf32> to vector<8x8xf32>
    %19 = vector.extract_strided_slice %8 {offsets = [0, 0], sizes = [8, 8], strides = [1, 1]} : vector<8x32xf32> to vector<8x8xf32>
    %20 = vector.extract_strided_slice %9 {offsets = [0, 0], sizes = [8, 8], strides = [1, 1]} : vector<8x32xf32> to vector<8x8xf32>
    %cst_13 = arith.constant dense<0.000000e+00> : vector<8x8xf32>
    %21 = tpu.matmul %18, %19, %cst_13 {dimension_numbers = #tpu.dot_dimension_numbers<[1], [1], [0], [0], [0, 0, 1, 0], [], []>} : vector<8x8xf32>, vector<8x8xf32>, vector<8x8xf32> -> vector<8x8xf32>
    %cst_14 = arith.constant -1.000000e+30 : f32
    %22 = vector.broadcast %cst_14 : f32 to vector<8x8xf32>
    %23 = arith.select %15, %21, %22 : vector<8x8xi1>, vector<8x8xf32>
    %cst_15 = arith.constant dense<0xFF800000> : vector<8xf32>
    %24 = vector.multi_reduction <maximumf>, %23, %cst_15 [1] : vector<8x8xf32> to vector<8xf32>
    %25 = vector.shape_cast %24 : vector<8xf32> to vector<8x1xf32>
    %26 = vector.broadcast %25 : vector<8x1xf32> to vector<8x8xf32>
    %27 = arith.subf %23, %26 : vector<8x8xf32>
    %28 = math.exp %27 : vector<8x8xf32>
    %cst_16 = arith.constant dense<0.000000e+00> : vector<8xf32>
    %29 = vector.multi_reduction <add>, %28, %cst_16 [1] : vector<8x8xf32> to vector<8xf32>
    %30 = vector.shape_cast %29 : vector<8xf32> to vector<8x1xf32>
    %31 = tpu.reciprocal %30 {approx = true} : vector<8x1xf32> -> vector<8x1xf32>
    %32 = vector.broadcast %31 : vector<8x1xf32> to vector<8x8xf32>
    %33 = arith.mulf %28, %32 : vector<8x8xf32>
    %cst_17 = arith.constant dense<0.000000e+00> : vector<8x8xf32>
    %34 = tpu.matmul %33, %20, %cst_17 {dimension_numbers = #tpu.dot_dimension_numbers<[1], [0], [0], [1], [0, 0, 1, 1], [], []>} : vector<8x8xf32>, vector<8x8xf32>, vector<8x8xf32> -> vector<8x8xf32>
    %35 = vector.extract_strided_slice %16 {offsets = [0, 0], sizes = [8, 32], strides = [1, 1]} : vector<32x32xf32> to vector<8x32xf32>
    %cst_18 = arith.constant dense<0.000000e+00> : vector<8x32xf32>
    %36 = tpu.matmul %34, %35, %cst_18 {dimension_numbers = #tpu.dot_dimension_numbers<[1], [0], [0], [1], [0, 0, 1, 1], [], []>} : vector<8x8xf32>, vector<8x32xf32>, vector<8x32xf32> -> vector<8x32xf32>
    %37 = arith.addf %17, %36 : vector<8x32xf32>
    %38 = vector.extract_strided_slice %5 {offsets = [0, 8], sizes = [8, 8], strides = [1, 1]} : vector<8x32xf32> to vector<8x8xf32>
    %39 = vector.extract_strided_slice %8 {offsets = [0, 8], sizes = [8, 8], strides = [1, 1]} : vector<8x32xf32> to vector<8x8xf32>
    %40 = vector.extract_strided_slice %9 {offsets = [0, 8], sizes = [8, 8], strides = [1, 1]} : vector<8x32xf32> to vector<8x8xf32>
    %cst_19 = arith.constant dense<0.000000e+00> : vector<8x8xf32>
    %41 = tpu.matmul %38, %39, %cst_19 {dimension_numbers = #tpu.dot_dimension_numbers<[1], [1], [0], [0], [0, 0, 1, 0], [], []>} : vector<8x8xf32>, vector<8x8xf32>, vector<8x8xf32> -> vector<8x8xf32>
    %cst_20 = arith.constant -1.000000e+30 : f32
    %42 = vector.broadcast %cst_20 : f32 to vector<8x8xf32>
    %43 = arith.select %15, %41, %42 : vector<8x8xi1>, vector<8x8xf32>
    %cst_21 = arith.constant dense<0xFF800000> : vector<8xf32>
    %44 = vector.multi_reduction <maximumf>, %43, %cst_21 [1] : vector<8x8xf32> to vector<8xf32>
    %45 = vector.shape_cast %44 : vector<8xf32> to vector<8x1xf32>
    %46 = vector.broadcast %45 : vector<8x1xf32> to vector<8x8xf32>
    %47 = arith.subf %43, %46 : vector<8x8xf32>
    %48 = math.exp %47 : vector<8x8xf32>
    %cst_22 = arith.constant dense<0.000000e+00> : vector<8xf32>
    %49 = vector.multi_reduction <add>, %48, %cst_22 [1] : vector<8x8xf32> to vector<8xf32>
    %50 = vector.shape_cast %49 : vector<8xf32> to vector<8x1xf32>
    %51 = tpu.reciprocal %50 {approx = true} : vector<8x1xf32> -> vector<8x1xf32>
    %52 = vector.broadcast %51 : vector<8x1xf32> to vector<8x8xf32>
    %53 = arith.mulf %48, %52 : vector<8x8xf32>
    %cst_23 = arith.constant dense<0.000000e+00> : vector<8x8xf32>
    %54 = tpu.matmul %53, %40, %cst_23 {dimension_numbers = #tpu.dot_dimension_numbers<[1], [0], [0], [1], [0, 0, 1, 1], [], []>} : vector<8x8xf32>, vector<8x8xf32>, vector<8x8xf32> -> vector<8x8xf32>
    %55 = vector.extract_strided_slice %16 {offsets = [8, 0], sizes = [8, 32], strides = [1, 1]} : vector<32x32xf32> to vector<8x32xf32>
    %cst_24 = arith.constant dense<0.000000e+00> : vector<8x32xf32>
    %56 = tpu.matmul %54, %55, %cst_24 {dimension_numbers = #tpu.dot_dimension_numbers<[1], [0], [0], [1], [0, 0, 1, 1], [], []>} : vector<8x8xf32>, vector<8x32xf32>, vector<8x32xf32> -> vector<8x32xf32>
    %57 = arith.addf %37, %56 : vector<8x32xf32>
    %58 = vector.extract_strided_slice %5 {offsets = [0, 16], sizes = [8, 8], strides = [1, 1]} : vector<8x32xf32> to vector<8x8xf32>
    %59 = vector.extract_strided_slice %8 {offsets = [0, 16], sizes = [8, 8], strides = [1, 1]} : vector<8x32xf32> to vector<8x8xf32>
    %60 = vector.extract_strided_slice %9 {offsets = [0, 16], sizes = [8, 8], strides = [1, 1]} : vector<8x32xf32> to vector<8x8xf32>
    %cst_25 = arith.constant dense<0.000000e+00> : vector<8x8xf32>
    %61 = tpu.matmul %58, %59, %cst_25 {dimension_numbers = #tpu.dot_dimension_numbers<[1], [1], [0], [0], [0, 0, 1, 0], [], []>} : vector<8x8xf32>, vector<8x8xf32>, vector<8x8xf32> -> vector<8x8xf32>
    %cst_26 = arith.constant -1.000000e+30 : f32
    %62 = vector.broadcast %cst_26 : f32 to vector<8x8xf32>
    %63 = arith.select %15, %61, %62 : vector<8x8xi1>, vector<8x8xf32>
    %cst_27 = arith.constant dense<0xFF800000> : vector<8xf32>
    %64 = vector.multi_reduction <maximumf>, %63, %cst_27 [1] : vector<8x8xf32> to vector<8xf32>
    %65 = vector.shape_cast %64 : vector<8xf32> to vector<8x1xf32>
    %66 = vector.broadcast %65 : vector<8x1xf32> to vector<8x8xf32>
    %67 = arith.subf %63, %66 : vector<8x8xf32>
    %68 = math.exp %67 : vector<8x8xf32>
    %cst_28 = arith.constant dense<0.000000e+00> : vector<8xf32>
    %69 = vector.multi_reduction <add>, %68, %cst_28 [1] : vector<8x8xf32> to vector<8xf32>
    %70 = vector.shape_cast %69 : vector<8xf32> to vector<8x1xf32>
    %71 = tpu.reciprocal %70 {approx = true} : vector<8x1xf32> -> vector<8x1xf32>
    %72 = vector.broadcast %71 : vector<8x1xf32> to vector<8x8xf32>
    %73 = arith.mulf %68, %72 : vector<8x8xf32>
    %cst_29 = arith.constant dense<0.000000e+00> : vector<8x8xf32>
    %74 = tpu.matmul %73, %60, %cst_29 {dimension_numbers = #tpu.dot_dimension_numbers<[1], [0], [0], [1], [0, 0, 1, 1], [], []>} : vector<8x8xf32>, vector<8x8xf32>, vector<8x8xf32> -> vector<8x8xf32>
    %75 = vector.extract_strided_slice %16 {offsets = [16, 0], sizes = [8, 32], strides = [1, 1]} : vector<32x32xf32> to vector<8x32xf32>
    %cst_30 = arith.constant dense<0.000000e+00> : vector<8x32xf32>
    %76 = tpu.matmul %74, %75, %cst_30 {dimension_numbers = #tpu.dot_dimension_numbers<[1], [0], [0], [1], [0, 0, 1, 1], [], []>} : vector<8x8xf32>, vector<8x32xf32>, vector<8x32xf32> -> vector<8x32xf32>
    %77 = arith.addf %57, %76 : vector<8x32xf32>
    %78 = vector.extract_strided_slice %5 {offsets = [0, 24], sizes = [8, 8], strides = [1, 1]} : vector<8x32xf32> to vector<8x8xf32>
    %79 = vector.extract_strided_slice %8 {offsets = [0, 24], sizes = [8, 8], strides = [1, 1]} : vector<8x32xf32> to vector<8x8xf32>
    %80 = vector.extract_strided_slice %9 {offsets = [0, 24], sizes = [8, 8], strides = [1, 1]} : vector<8x32xf32> to vector<8x8xf32>
    %cst_31 = arith.constant dense<0.000000e+00> : vector<8x8xf32>
    %81 = tpu.matmul %78, %79, %cst_31 {dimension_numbers = #tpu.dot_dimension_numbers<[1], [1], [0], [0], [0, 0, 1, 0], [], []>} : vector<8x8xf32>, vector<8x8xf32>, vector<8x8xf32> -> vector<8x8xf32>
    %cst_32 = arith.constant -1.000000e+30 : f32
    %82 = vector.broadcast %cst_32 : f32 to vector<8x8xf32>
    %83 = arith.select %15, %81, %82 : vector<8x8xi1>, vector<8x8xf32>
    %cst_33 = arith.constant dense<0xFF800000> : vector<8xf32>
    %84 = vector.multi_reduction <maximumf>, %83, %cst_33 [1] : vector<8x8xf32> to vector<8xf32>
    %85 = vector.shape_cast %84 : vector<8xf32> to vector<8x1xf32>
    %86 = vector.broadcast %85 : vector<8x1xf32> to vector<8x8xf32>
    %87 = arith.subf %83, %86 : vector<8x8xf32>
    %88 = math.exp %87 : vector<8x8xf32>
    %cst_34 = arith.constant dense<0.000000e+00> : vector<8xf32>
    %89 = vector.multi_reduction <add>, %88, %cst_34 [1] : vector<8x8xf32> to vector<8xf32>
    %90 = vector.shape_cast %89 : vector<8xf32> to vector<8x1xf32>
    %91 = tpu.reciprocal %90 {approx = true} : vector<8x1xf32> -> vector<8x1xf32>
    %92 = vector.broadcast %91 : vector<8x1xf32> to vector<8x8xf32>
    %93 = arith.mulf %88, %92 : vector<8x8xf32>
    %cst_35 = arith.constant dense<0.000000e+00> : vector<8x8xf32>
    %94 = tpu.matmul %93, %80, %cst_35 {dimension_numbers = #tpu.dot_dimension_numbers<[1], [0], [0], [1], [0, 0, 1, 1], [], []>} : vector<8x8xf32>, vector<8x8xf32>, vector<8x8xf32> -> vector<8x8xf32>
    %95 = vector.extract_strided_slice %16 {offsets = [24, 0], sizes = [8, 32], strides = [1, 1]} : vector<32x32xf32> to vector<8x32xf32>
    %cst_36 = arith.constant dense<0.000000e+00> : vector<8x32xf32>
    %96 = tpu.matmul %94, %95, %cst_36 {dimension_numbers = #tpu.dot_dimension_numbers<[1], [0], [0], [1], [0, 0, 1, 1], [], []>} : vector<8x8xf32>, vector<8x32xf32>, vector<8x32xf32> -> vector<8x32xf32>
    %97 = arith.addf %77, %96 : vector<8x32xf32>
    %c0_37 = arith.constant 0 : index
    %c0_38 = arith.constant 0 : index
    %98 = vector.load %arg7[%c0_37, %c0_38] : memref<1x32xf32, #tpu.memory_space<vmem>>, vector<1x32xf32>
    %99 = vector.broadcast %98 : vector<1x32xf32> to vector<8x32xf32>
    %100 = arith.addf %97, %99 : vector<8x32xf32>
    %c0_39 = arith.constant 0 : index
    %c0_40 = arith.constant 0 : index
    %c0_41 = arith.constant 0 : index
    %101 = vector.load %arg8[%c0_39, %c0_40, %c0_41] : memref<1x8x32xf32, #tpu.memory_space<vmem>>, vector<1x8x32xf32>
    %102 = vector.shape_cast %101 : vector<1x8x32xf32> to vector<8x32xf32>
    %103 = vector.shape_cast %100 : vector<8x32xf32> to vector<1x8x32xf32>
    tpu.vector_store %arg8[%c0_39, %c0_40, %c0_41], %103 {strides = array<i32>} : memref<1x8x32xf32, #tpu.memory_space<vmem>>, vector<1x8x32xf32>,
    return
  }
  func.func @transform_0(%arg0: i32, %arg1: i32) -> (i32, i32, i32) {
    %c0_i32 = arith.constant 0 : i32
    %c0_i32_0 = arith.constant 0 : i32
    return %arg0, %arg1, %c0_i32 : i32, i32, i32
  }
  func.func @transform_1(%arg0: i32, %arg1: i32) -> (i32, i32, i32) {
    %c0_i32 = arith.constant 0 : i32
    %c0_i32_0 = arith.constant 0 : i32
    %c0_i32_1 = arith.constant 0 : i32
    return %arg0, %c0_i32, %c0_i32_0 : i32, i32, i32
  }
  func.func @transform_2(%arg0: i32, %arg1: i32) -> (i32, i32) {
    %c0_i32 = arith.constant 0 : i32
    %c0_i32_0 = arith.constant 0 : i32
    %c0_i32_1 = arith.constant 0 : i32
    return %c0_i32, %c0_i32_0 : i32, i32
  }
  func.func @transform_3(%arg0: i32, %arg1: i32) -> (i32, i32) {
    %c0_i32 = arith.constant 0 : i32
    %c0_i32_0 = arith.constant 0 : i32
    %c0_i32_1 = arith.constant 0 : i32
    return %c0_i32, %c0_i32_0 : i32, i32
  }
  func.func @transform_4(%arg0: i32, %arg1: i32) -> (i32, i32) {
    %c0_i32 = arith.constant 0 : i32
    %c0_i32_0 = arith.constant 0 : i32
    %c0_i32_1 = arith.constant 0 : i32
    return %c0_i32, %c0_i32_0 : i32, i32
  }
  func.func @transform_5(%arg0: i32, %arg1: i32) -> (i32, i32) {
    %c0_i32 = arith.constant 0 : i32
    %c0_i32_0 = arith.constant 0 : i32
    %c0_i32_1 = arith.constant 0 : i32
    return %c0_i32, %c0_i32_0 : i32, i32
  }
  func.func @transform_6(%arg0: i32, %arg1: i32) -> (i32, i32, i32) {
    %c0_i32 = arith.constant 0 : i32
    %c0_i32_0 = arith.constant 0 : i32
    return %arg0, %arg1, %c0_i32 : i32, i32, i32
  }
}

</mosaic_0001>

<bundles_post_ra>
// kernel: tpu_custom_call.1
= control target key start
LH: loop header
LB: loop body
LE: loop exit
PB: predicated region body
PF: predicated region fallthrough
CT: control target
= control target key end

     0   :  { %s2662_s0 = inlined_call_operand.hbm [shape: f32[2,8,32], index: 0, kind: input, shape index: {}]   ;;  %s2663_s1 = inlined_call_operand.hbm [shape: f32[2,8,32], index: 1, kind: input, shape index: {}]   ;;  %s2664_s2 = inlined_call_operand.hbm [shape: f32[32,32], index: 2, kind: input, shape index: {}]   ;;  %s2665_s3 = inlined_call_operand.hbm [shape: f32[32,64], index: 3, kind: input, shape index: {}]   ;;  %s2666_s4 = inlined_call_operand.hbm [shape: f32[32,32], index: 4, kind: input, shape index: {}]   ;;  %s2667_s5 = inlined_call_operand.vmem [shape: f32[1,32], index: 5, kind: input, shape index: {}]   ;;  %s2668_s6 = inlined_call_operand.hbm [shape: f32[2,8,32], index: 6, kind: output, shape index: {}]  }
   0x1   :  { %2675 = sst [smem:[#allocation19_spill]] %s2664_s2 }
   0x2   :  { %2676 = sst [smem:[#allocation20_spill]] %s2665_s3 }
   0x3   :  { %2677 = sst [smem:[#allocation21_spill]] %s2666_s4 }
   0x4   :  { %11 = vsyncpa [#allocation3], 0 }
   0x5   :  { %13 = vsyncpa [#allocation3 + $0x1], 0 }
   0x6   :  { %14 = vsyncpa [#allocation6], 0 }
   0x7   :  { %16 = vsyncpa [#allocation6 + $0x1], 0 }
   0x8   :  { %17 = vsyncpa [#allocation9], 0 }
   0x9   :  { %18 = vsyncpa [#allocation4], 0 }
   0xa   :  { %20 = vsyncpa [#allocation4 + $0x1], 0  ;;  %s2233_s21 = smov 0   ;;  %s2235_s22 = smov 0  }
   0xb   :  { %s2237_s23 = smov 0   ;;  %s2239_s24 = smov 0  }
   0xc   :  { %s2241_s25 = smov 0   ;;  %s2243_s26 = smov 0  }
   0xd LB: > { %2678 = sst [smem:[#allocation17_spill]] %s2158_s21  ;;  %s2264_s27 = sadd.s32 4294967295, %s2178_s26   ;;  %s2178_s26 = sphi %s2243_s26, %s26_s26   ;;  %s2174_s25 = sphi %s2241_s25, %s2706_s25   ;;  %s2170_s24 = sphi %s2239_s24, %s2705_s24   ;;  %s2166_s23 = sphi %s2237_s23, %s2704_s23   ;;  %s2162_s22 = sphi %s2235_s22, %s2703_s22   ;;  %s2158_s21 = sphi %s2233_s21, %s2702_s21  }
   0xe   : > { %s1646_s28 = sadd.s32 4294967294, %s2178_s26   ;;  %p60_p0 = scmp.ne.s32.totalorder %s2162_s22, %s2158_s21 }
   0xf   : > { %p2669_p1 = scmp.eq.s32.totalorder %s2264_s27, 0  ;;  %p202_p3 = scmp.eq.s32.totalorder %s1646_s28, 1 }
  0x10   : > { %p1647_p5 = scmp.ge.s32.totalorder %s2178_s26, 1  ;;  %p209_p7 = scmp.lt.s32.totalorder %s2178_s26, 3 }
  0x11   : > { %p2273_p4 = por %p2669_p1, %p60_p0  ;;  %p2278_p6 = por %p202_p3, %p60_p0 }
  0x12   : > { %p2283_p8 = pnand %p1647_p5, %p209_p7  ;;  %s2180_s8 = smov [#allocation7]  }
  0x13   : > { %s2679_s29 = scalar_select %p2273_p4, 1, 0 }
  0x14   : > { %s2680_s30 = scalar_select %p2278_p6, 1, 0 }
  0x15   : > { %s2682_s7 = scalar_select %p2283_p8, 1, 0 }
  0x16   : > { %2681 = sst [smem:[#allocation18_spill]] %s2680_s30  ;;  %s221_s9 = sshll.u32 %s2180_s8, 4  ;;  %s2287_s9 = int_to_ptr.vmem [resolvable:$true] %s221_s9 }
  0x17   : > { %p1832_p9 = pneg %p2283_p8  ;;  %s2181_s11 = smov [#allocation8]  }
  0x18   : > { %s234_s12 = sshll.u32 %s2181_s11, 4  ;;  %s2182_s13 = smov [#allocation10]   ;;  %s2298_s12 = int_to_ptr.vmem [resolvable:$true] %s234_s12 }
  0x19   : > { %p2294_p11 = pnand %p1832_p9, %p2669_p1  ;;  %s2300_s14 = sshll.u32 %s2182_s13, 4  ;;  %s248_s14 = int_to_ptr.vmem [resolvable:$true] %s2300_s14 }
  0x1a   : > { %s2684_s2 = sld [smem:[#allocation19_spill]] }
  0x1b   : > { %p2310_p13 = pneg %p2294_p11 }
  0x20   : > { %s1940_s17 = scalar_lea.hbm %s2684_s2, 512 }
  0x21   : > { %p1941_p12 = scmp.ne.s32.totalorder %s2684_s2, %s1940_s17  ;;  %p1947_p5 = scmp.lt.u32.totalorder %s1940_s17, %s2684_s2 }
  0x23   : > { %p1943_p0 = pnand %p2310_p13, %p1941_p12 }
  0x25   : > { %p1944_p3 = pneg %p1943_p0 }
  0x27   : > { %p1949_p7 = pnand %p1947_p5, %p1944_p3 }
  0x29   : > { %1952 = shalt.err (!%p1949_p7)
}
  0x2a   : > { %s1953_s11 = scalar_lea.vmem %s2287_s9, 512  ;;  %p1961_p2 = scmp.lt.s32.totalorder %s2287_s9, %s2287_s9 }
  0x2b   : > { %p1954_p9 = scmp.ne.s32.totalorder %s2287_s9, %s1953_s11  ;;  %p1962_p6 = scmp.lt.s32.totalorder %s1953_s11, %s1953_s11 }
  0x2d   : > { %p1956_p10 = pnand %p1954_p9, %p2310_p13  ;;  %p1963_p12 = por %p1962_p6, %p1961_p2 }
  0x2f   : > { %p1957_p1 = pneg %p1956_p10 }
  0x31   : > { %p1964_p0 = pnand %p1963_p12, %p1957_p1 }
  0x33   : > { %1967 = shalt.err (!%p1964_p0)
}
  0x34   : > { %s2183_s13 = smov 128   ;;  %s2184_s15 = smov 8  }
  0x35   : > { %1835 = dma.hbm_to_vmem [thread:$0]  (!%p2294_p11), %s2684_s2, 512, %s2287_s9, [#allocation6], %s2183_s13, %s2183_s13, %s2184_s15  }
  0x36   : > { %s2686_s3 = sld [smem:[#allocation20_spill]] }
  0x3c   : > { %s1968_s28 = scalar_lea.hbm %s2686_s3, 512 }
  0x3d   : > { %p1969_p1 = scmp.ne.s32.totalorder %s2686_s3, %s1968_s28  ;;  %p1975_p10 = scmp.lt.u32.totalorder %s1968_s28, %s2686_s3 }
  0x3f   : > { %p1971_p2 = pnand %p1969_p1, %p2310_p13 }
  0x41   : > { %p1972_p6 = pneg %p1971_p2 }
  0x43   : > { %p1977_p3 = pnand %p1975_p10, %p1972_p6 }
  0x45   : > { %1980 = shalt.err (!%p1977_p3)
}
  0x46   : > { %s1981_s9 = scalar_lea.vmem %s2298_s12, 512  ;;  %p1989_p12 = scmp.lt.s32.totalorder %s2298_s12, %s2298_s12 }
  0x47   : > { %p1982_p5 = scmp.ne.s32.totalorder %s2298_s12, %s1981_s9  ;;  %p1990_p0 = scmp.lt.s32.totalorder %s1981_s9, %s1981_s9 }
  0x49   : > { %p1984_p7 = pnand %p1982_p5, %p2310_p13  ;;  %p1991_p1 = por %p1990_p0, %p1989_p12 }
  0x4b   : > { %p1985_p9 = pneg %p1984_p7 }
  0x4d   : > { %p1992_p2 = pnand %p1991_p1, %p1985_p9 }
  0x4f   : > { %1995 = shalt.err (!%p1992_p2)
}
  0x50   : > { %1838 = dma.hbm_to_vmem [thread:$0]  (!%p2294_p11), %s2686_s3, 512, %s2298_s12, [#allocation9], %s2183_s13, %s2183_s13, %s2184_s15  }
  0x51   : > { %s2687_s4 = sld [smem:[#allocation21_spill]] }
  0x57   : > { %s1996_s18 = scalar_lea.hbm %s2687_s4, 512 }
  0x58   : > { %p1997_p6 = scmp.ne.s32.totalorder %s2687_s4, %s1996_s18  ;;  %p2003_p5 = scmp.lt.u32.totalorder %s1996_s18, %s2687_s4 }
  0x5a   : > { %p1999_p10 = pnand %p1997_p6, %p2310_p13 }
  0x5c   : > { %p2000_p3 = pneg %p1999_p10 }
  0x5e   : > { %p2005_p7 = pnand %p2003_p5, %p2000_p3 }
  0x60   : > { %2008 = shalt.err (!%p2005_p7)
}
  0x61   : > { %s2009_s9 = scalar_lea.vmem %s248_s14, 512  ;;  %p2017_p1 = scmp.lt.s32.totalorder %s248_s14, %s248_s14 }
  0x62   : > { %p2010_p9 = scmp.ne.s32.totalorder %s248_s14, %s2009_s9  ;;  %p2018_p2 = scmp.lt.s32.totalorder %s2009_s9, %s2009_s9 }
  0x64   : > { %p2012_p12 = pnand %p2010_p9, %p2310_p13  ;;  %p2019_p4 = por %p2018_p2, %p2017_p1 }
  0x66   : > { %p2013_p0 = pneg %p2012_p12 }
  0x68   : > { %p2020_p8 = pnand %p2019_p4, %p2013_p0 }
  0x6a   : > { %2023 = shalt.err (!%p2020_p8)
}
  0x6b   : > { %1841 = dma.hbm_to_vmem [thread:$0]  (!%p2294_p11), %s2687_s4, 512, %s248_s14, [#allocation9], %s2183_s13, %s2183_s13, %s2184_s15  }
  0x6c   : > { %s47_s20 = sadd.s32 1, %s2166_s23  ;;  %s38_s10 = sadd.s32 1, %s2174_s25 }
  0x6d   : > { %p54_p4 = scmp.ne.s32.totalorder %s2166_s23, %s2162_s22  ;;  %p40_p8 = scmp.ge.s32.totalorder %s38_s10, 2 }
  0x6e   : > { %p55_p13 = scmp.eq.s32.totalorder %s2178_s26, 0  ;;  %p2688_p6 = scmp.eq.s32.totalorder %s2264_s27, 1 }
  0x6f   : > { %p1856_p3 = scmp.lt.s32.totalorder %s2178_s26, 2  ;;  %s2708_s10 = smov (%p40_p8, %s38_s10), 0 }
  0x70   : > { %p2389_p10 = por %p2688_p6, %p54_p4  ;;  %p56_p5 = por %p55_p13, %p54_p4 }
  0x71   : > { %s264_s16 = sand.u32 1, %s2166_s23   ;;  %s42_s17 = ssub.s32 %s2174_s25, %s2708_s10 }
  0x72   : > { %s2689_s30 = scalar_select %p2389_p10, 1, 0 }
  0x73   : > { %p45_p11 = scmp.eq.s32.totalorder %s42_s17, 0  ;;  %s2399_s14 = sshll.u32 %s264_s16, 3 }
  0x74   : > { %s1653_s13 = sshll.u32 %s2174_s25, 7  ;;  %s268_s8 = scalar_lea.vmem [#allocation2], %s2399_s14 }
  0x75   : > { %s2403_s15 = scalar_select %p45_p11, %s2166_s23, %s47_s20  }
  0x76   : > { %s2408_s28 = scalar_lea.hbm %s2662_s0, %s1653_s13  ;;  %s276_s11 = sshll.u32 %s268_s8, 4  ;;  %s2411_s11 = int_to_ptr.vmem [resolvable:$true] %s276_s11 }
  0x77   : > { %p2415_p7 = pnand %p1856_p3, %p56_p5  ;;  %s2422_s20 = scalar_lea.hbm %s2663_s1, %s1653_s13 }
  0x78   : > { %s283_s17 = sand.u32 1, %s2178_s26   ;;  %s265_s18 = scalar_lea.sflag [#allocation3], %s264_s16 }
  0x79   : > { %s2024_s19 = scalar_lea.hbm %s2408_s28, 128  ;;  %p2026_p12 = pneg %p2415_p7 }
  0x7a   : > { %p2025_p9 = scmp.ne.s32.totalorder %s2408_s28, %s2024_s19  ;;  %s2029_s3 = scalar_lea.hbm %s2662_s0, 256 }
  0x7b   : > { %p2030_p2 = scmp.lt.u32.totalorder %s2408_s28, %s2662_s0  ;;  %p2031_p4 = scmp.lt.u32.totalorder %s2029_s3, %s2024_s19 }
  0x7c   : > { %p2027_p0 = pnand %p2026_p12, %p2025_p9  ;;  %p2033_p13 = scmp.lt.u32.totalorder %s2024_s19, %s2408_s28 }
  0x7d   : > { %p2032_p8 = por %p2031_p4, %p2030_p2 }
  0x7e   : > { %p2028_p1 = pneg %p2027_p0 }
  0x7f   : > { %p2034_p6 = por %p2033_p13, %p2032_p8 }
  0x81   : > { %p2035_p3 = pnand %p2034_p6, %p2028_p1 }
  0x83   : > { %2038 = shalt.err (!%p2035_p3)
}
  0x84   : > { %s2039_s16 = scalar_lea.vmem %s2411_s11, 128  ;;  %s2185_s2 = smov [#allocation2]  }
  0x85   : > { %p2040_p5 = scmp.ne.s32.totalorder %s2411_s11, %s2039_s16  ;;  %s2044_s13 = sshll.u32 %s2185_s2, 4  ;;  %s2045_s13 = int_to_ptr.vmem [resolvable:$false] %s2044_s13 }
  0x86   : > { %s2046_s4 = scalar_lea.vmem %s2045_s13, 256  ;;  %p2047_p0 = scmp.lt.s32.totalorder %s2411_s11, %s2045_s13 }
  0x87   : > { %p2042_p11 = pnand %p2040_p5, %p2026_p12  ;;  %p2048_p2 = scmp.lt.s32.totalorder %s2046_s4, %s2039_s16 }
  0x89   : > { %p2043_p9 = pneg %p2042_p11  ;;  %p2049_p4 = por %p2048_p2, %p2047_p0 }
  0x8b   : > { %p2050_p8 = pnand %p2049_p4, %p2043_p9 }
  0x8d   : > { %2053 = shalt.err (!%p2050_p8)
}
  0x8e   : > { %1845 = dma.hbm_to_vmem [thread:$0]  (!%p2415_p7), %s2408_s28, 128, %s2411_s11, %s265_s18  }
  0x8f   : > { %s287_s3 = scalar_lea.vmem [#allocation5], %s2399_s14  ;;  %s284_s19 = scalar_lea.sflag [#allocation6], %s283_s17 }
  0x90   : > { %s294_s21 = sshll.u32 %s287_s3, 4  ;;  %s2054_s8 = scalar_lea.hbm %s2422_s20, 128  ;;  %s295_s21 = int_to_ptr.vmem [resolvable:$true] %s294_s21 }
  0x91   : > { %p2055_p1 = scmp.ne.s32.totalorder %s2422_s20, %s2054_s8  ;;  %s2059_s2 = scalar_lea.hbm %s2663_s1, 256 }
  0x92   : > { %p2060_p3 = scmp.lt.u32.totalorder %s2422_s20, %s2663_s1  ;;  %p2061_p5 = scmp.lt.u32.totalorder %s2059_s2, %s2054_s8 }
  0x93   : > { %p2057_p13 = pnand %p2055_p1, %p2026_p12  ;;  %p2063_p9 = scmp.lt.u32.totalorder %s2054_s8, %s2422_s20 }
  0x94   : > { %p2062_p11 = por %p2061_p5, %p2060_p3 }
  0x95   : > { %p2058_p6 = pneg %p2057_p13 }
  0x96   : > { %p2064_p0 = por %p2063_p9, %p2062_p11 }
  0x98   : > { %p2065_p2 = pnand %p2064_p0, %p2058_p6 }
  0x9a   : > { %2068 = shalt.err (!%p2065_p2)
}
  0x9b   : > { %s2069_s14 = scalar_lea.vmem %s295_s21, 128  ;;  %s2186_s28 = smov [#allocation5]  }
  0x9c   : > { %p2070_p4 = scmp.ne.s32.totalorder %s295_s21, %s2069_s14  ;;  %s2074_s11 = sshll.u32 %s2186_s28, 4  ;;  %s2075_s11 = int_to_ptr.vmem [resolvable:$false] %s2074_s11 }
  0x9d   : > { %s2076_s17 = scalar_lea.vmem %s2075_s11, 256  ;;  %p2077_p13 = scmp.lt.s32.totalorder %s295_s21, %s2075_s11 }
  0x9e   : > { %p2072_p8 = pnand %p2070_p4, %p2026_p12  ;;  %p2078_p10 = scmp.lt.s32.totalorder %s2076_s17, %s2069_s14 }
  0xa0   : > { %p2073_p1 = pneg %p2072_p8  ;;  %p2079_p3 = por %p2078_p10, %p2077_p13 }
  0xa2   : > { %p2080_p5 = pnand %p2079_p3, %p2073_p1 }
  0xa4   : > { %2083 = shalt.err (!%p2080_p5)
}
  0xa5   : > { %1848 = dma.hbm_to_vmem [thread:$0]  (!%p2415_p7), %s2422_s20, 128, %s295_s21, %s284_s19  }
  0xa6   : > { %p2691_p6 = scmp.ne.s32.totalorder %s2682_s7, 0 }
  0xa7   : > { %s2475_s18 = sand.u32 (!%p2691_p6), 1, %s2162_s22   ;;  %p2692_p10 = scmp.ne.s32.totalorder (!%p2691_p6), %s2679_s29, 0 }
  0xa8   : > { %303 = sbr.rel (%p2691_p6) target bundleno = 2769 (0xad1), region = 44  ;;  %s2478_s3 = sshll.u32 (!%p2691_p6), %s2475_s18, 3 }
  0xa9   : > { %s306_s8 = scalar_lea.sflag (!%p2691_p6), [#allocation3], %s2475_s18  ;;  %s309_s12 = scalar_lea.vmem (!%p2691_p6), [#allocation2], %s2478_s3 }
  0xaf   : > { %2137 = dma.done.wait (%p2692_p10), %s306_s8, 128  }
  0xb0   : > { %2139 = vsyncadd (%p2692_p10), %s306_s8, 4294967168  ;;  %s314_s7 = sand.u32 1, %s2264_s27   ;;  %s318_s20 = scalar_lea.vmem [#allocation5], %s2478_s3 }
  0xb1   : > { %s315_s9 = scalar_lea.sflag [#allocation6], %s314_s7 }
  0xb2   : > { %2141 = dma.done.wait (%p2692_p10), %s315_s9, 128  }
  0xb3   : > { %2143 = vsyncadd (%p2692_p10), %s315_s9, 4294967168  ;;  %p2693_p7 = scmp.eq.s32.totalorder %s2264_s27, 0 }
  0xb5   : > { %2145 = dma.done.wait (%p2693_p7), [#allocation6], 512   ;;  %p2694_p12 = pmov %p2693_p7 }
  0xb6   : > { %p2695_p11 = pmov %p2693_p7 }
  0xb7   : > { %2147 = vsyncadd (%p2694_p12), [#allocation6], 4294966784 }
  0xb8   : > { %2149 = dma.done.wait (%p2695_p11), [#allocation9], 1024   ;;  %p2696_p9 = pmov %p2693_p7 }
  0xb9   : > { %v2187_v0 = vmov 0.0|0.0   ;;  %vm2188_vm0 = vmmov 0   ;;  %v2189_v1 = vmov 0.0   ;;  %v444_v2 = vld [vmem:[#allocation8] sm:$0xff]  ;;  %v445_v3 = vld [vmem:[#allocation8 + $0x8] sm:$0xff]  ;;  %v446_v7 = vld [vmem:[#allocation8 + $0x10] sm:$0xff]  ;;  %v522_v22 = vlaneseq }
  0xba   : > { %2151 = vsyncadd (%p2696_p9), [#allocation9], 4294966272  ;;  %1808 = vmatprep.subr.bf16.mxu1 %v2187_v0  ;;  %1802 = vmatprep.subr.bf16.mxu0 %v2187_v0  ;;  %v366_v4 = vld [vmem:[#allocation7] sm:$0xff]  ;;  %v1809_v5 = vpack.c.bf16 %v445_v3, %v444_v2  ;;  %v367_v6 = vld [vmem:[#allocation7 + $0x8] sm:$0xff]  ;;  %vm370_vm1 = vcmask 261120   ;;  %vm533_vm2 = vcmask 64512  }
  0xbb   : > { %1739 = vmatprep.mubr.msk.f32.mxu1 %vm2188_vm0, %v2189_v1  ;;  %1728 = vmatprep.mubr.msk.f32.mxu0 %vm2188_vm0, %v2189_v1  ;;  %v447_v8 = vld [vmem:[#allocation8 + $0x18] sm:$0xff]  ;;  %v1803_v9 = vpack.c.bf16 %v367_v6, %v366_v4  ;;  %v368_v10 = vld [vmem:[#allocation7 + $0x10] sm:$0xff]  ;;  %v364_v15 = vld [vmem:[%s309_s12] sm:$0xff]  ;;  %s2190_s27 = smov 120   ;;  %v2534_v23 = vshrl.u32 %v522_v22, 7  ;;  %v2536_v24 = vand.u32 127, %v522_v22 }
  0xbc   : > { %v369_v11 = vld [vmem:[#allocation7 + $0x18] sm:$0xff]  ;;  %1810 = vmatpush3.bf16.msra.mxu1 %v1809_v5  ;;  %v1812_v12 = vpack.c.bf16 %v447_v8, %v446_v7  ;;  %s2191_s29 = smov 96   ;;  %s2192_s21 = smov 88   ;;  %v530_v47 = vld [vmem:[#allocation10 + $0x8] sm:$0xff]  ;;  %v529_v52 = vld [vmem:[#allocation10] sm:$0xff] }
  0xbd   : > { %1804 = vmatpush3.bf16.msra.mxu0 %v1803_v9  ;;  %1811 = vmatprep.subr.bf16.mxu1 %v2187_v0  ;;  %v1806_v13 = vpack.c.bf16 %v369_v11, %v368_v10  ;;  %v365_v14 = vld [vmem:[%s318_s20] sm:$0xff]  ;;  %vm528_vm3 = vcmp.le.s32.totalorder %v2536_v24, %v2534_v23  ;;  %s2193_s19 = smov 112   ;;  %s2194_s16 = smov 80  }
  0xbe   : > { %1805 = vmatprep.subr.bf16.mxu0 %v2187_v0  ;;  %s2195_s2 = smov 104   ;;  %s2196_s13 = smov 72  }
  0xbf   : > { %s1683_s28 = sshll.u32 %s2170_s24, 7  ;;  %s363_s11 = scalar_lea.vmem [#allocation11], %s2478_s3 }
  0xc0   : > { %1813 = vmatpush3.bf16.msra.mxu1 %v1812_v12  ;;  %s1514_s17 = sshll.u32 %s363_s11, 4  ;;  %s2612_s7 = scalar_lea.hbm %s2668_s6, %s1683_s28  ;;  %s2614_s17 = int_to_ptr.vmem [resolvable:$true] %s1514_s17 }
  0xc1   : > { %1807 = vmatpush3.bf16.msra.mxu0 %v1806_v13  ;;  %1747 = vmatprep.subr.mxu1 %v2189_v1  ;;  %s1500_s9 = scalar_lea.sflag [#allocation4], %s2475_s18  ;;  %s2084_s20 = scalar_lea.vmem %s2614_s17, 128 }
  0xc2   : > { %1742 = vmatprep.subr.mxu0 %v2189_v1  ;;  %p2085_p0 = scmp.ne.s32.totalorder %s2614_s17, %s2084_s20  ;;  %p2697_p2 = scmp.ne.s32.totalorder %s2689_s30, 0 }
  0xc3   : > { %1740 = vmatmul.mubr.msk.f32.vlgmr.msra.gmra.mrb[0].mxu1 %vm370_vm1, %v365_v14  ;;  %s2197_s24 = smov [#allocation11]  }
  0xc4   : > { %1729 = vmatmul.mubr.msk.f32.vlgmr.msra.gmra.mrb[0].mxu0 %vm370_vm1, %v364_v15  ;;  %1749 = vmatprep.mubr.msk.f32.mxu1 %vm2188_vm0, %v2189_v1  ;;  %p2086_p4 = pnand %p2085_p0, %p2697_p2  ;;  %s2088_s3 = sshll.u32 %s2197_s24, 4  ;;  %s2089_s3 = int_to_ptr.vmem [resolvable:$false] %s2088_s3 }
  0xc5   : > { %1744 = vmatprep.mubr.msk.f32.mxu0 %vm2188_vm0, %v2189_v1  ;;  %p2091_p1 = scmp.lt.s32.totalorder %s2614_s17, %s2089_s3 }
  0xc6   : > { %p2087_p8 = pneg %p2086_p4 }
 0x196   : > { %v2516_v16 = vpop.f32.mrb[0].mxu1 }
 0x197   : > { %700 = vrot.lane.b32.xlu0 %v2516_v16, %s2190_s27  ;;  %v1741_v17 = vpop.f32.mrb[1].mxu1  ;;  %1743 = vmatpush3.xpose.msk.msra.mxu0 %vm533_vm2, %v2516_v16  ;;  %v2521_v18 = vpop.f32.mrb[0].mxu0 }
 0x198   : > { %v1730_v19 = vpop.f32.mrb[1].mxu0  ;;  %1752 = vmatprep.subr.mxu0 %v2189_v1  ;;  %v531_v17 = vld [vmem:[#allocation10 + $0x10] sm:$0xff] }
 0x19a   : > { %1745 = vmatmul.mubr.msk.f32.vlgmr.msra.gmra.mrb[2].mxu0 %vm533_vm2, %v2521_v18 }
 0x19b   : > { %698 = vrot.lane.b32.xlu0 %v2521_v18, %s2190_s27  ;;  %1754 = vmatprep.mubr.msk.f32.mxu0 %vm2188_vm0, %v2189_v1  ;;  %s2090_s27 = scalar_lea.vmem %s2089_s3, 256 }
 0x19c   : > { %p2092_p13 = scmp.lt.s32.totalorder %s2090_s27, %s2084_s20 }
 0x19e   : > { %p2093_p3 = por %p2092_p13, %p2091_p1 }
 0x1a0   : > { %p2094_p5 = pnand %p2093_p3, %p2087_p8 }
 0x209   : > { %v701_v20 = vpop.permute.xlu0 %700 }
 0x20a   : > { %1753 = vmatpush3.xpose.msk.msra.mxu0 %vm533_vm2, %v701_v20 }
 0x20b   : > { %1762 = vmatprep.subr.mxu0 %v2189_v1 }
 0x20d   : > { %v699_v21 = vpop.permute.xlu0 %698 }
 0x20e   : > { %1755 = vmatmul.mubr.msk.f32.vlgmr.msra.gmra.mrb[4].mxu0 %vm533_vm2, %v699_v21 }
 0x20f   : > { %1764 = vmatprep.mubr.msk.f32.mxu0 %vm2188_vm0, %v2189_v1  ;;  %1763 = vmatpush3.msra.mxu0 %v530_v47 }
 0x210   : > { %1772 = vmatprep.subr.mxu0 %v2189_v1 }
 0x26d   : > { %v606_v25 = vpop.f32.mrb[2].mxu0 }
 0x26e   : > { %v610_v26 = vsel %vm528_vm3, %v606_v25, -1e+30  ;;  %v1746_v27 = vpop.f32.mrb[3].mxu0 }
 0x26f   : > { %v611_v28 = vsel %vm533_vm2, %v610_v26, -inf }
 0x270   : > { %612 = vmax.xlane.f32.xlu1 %v611_v28 }
 0x2e1   : > { %v772_v29 = vpop.f32.mrb[4].mxu0 }
 0x2e2   : > { %v776_v30 = vsel %vm528_vm3, %v772_v29, -1e+30  ;;  %v1756_v31 = vpop.f32.mrb[5].mxu0 }
 0x2e3   : > { %v777_v32 = vsel %vm533_vm2, %v776_v30, -inf }
 0x2e4   : > { %778 = vmax.xlane.f32.xlu1 %v777_v32 }
 0x2f5   : > { %622 = vrot.lane.b32.xlu1 %v2516_v16, %s2191_s29 }
 0x2fd   : > { %v613_v33 = vpop.xlane.xlu1 %612 }
 0x2fe   : > { %v614_v34 = vsub.f32 %v610_v26, %v613_v33 }
 0x300   : > { %v615_v35 = vmul.f32 1.442695, %v614_v34 }
 0x302   : > { %1924 = vpow2.f32 %v615_v35 }
 0x30c   : > { %v1925_v36 = vpop.eup %1924 }
 0x30d   : > { %v617_v37 = vsel %vm533_vm2, %v1925_v36, 0.0 }
 0x30e   : > { %618 = vadd.xlane.f32.xlu0 %v617_v37 }
 0x371   : > { %v779_v38 = vpop.xlane.xlu1 %778 }
 0x372   : > { %v780_v39 = vsub.f32 %v776_v30, %v779_v38  ;;  %v1681_v38 = vld [vmem:[%s2667_s5] ss:$0 sm:$0xff] }
 0x374   : > { %v781_v40 = vmul.f32 1.442695, %v780_v39 }
 0x375   : > { %v623_v41 = vpop.permute.xlu1 %622 }
 0x376   : > { %1926 = vpow2.f32 %v781_v40  ;;  %1748 = vmatpush3.msra.mxu1 %v623_v41 }
 0x377   : > { %1757 = vmatprep.subr.mxu1 %v2189_v1 }
 0x380   : > { %v1927_v42 = vpop.eup %1926 }
 0x381   : > { %v783_v43 = vsel %vm533_vm2, %v1927_v42, 0.0 }
 0x382   : > { %784 = vadd.xlane.f32.xlu1 %v783_v43 }
 0x393   : > { %788 = vrot.lane.b32.xlu1 %v2516_v16, %s2192_s21 }
 0x397   : > { %1012 = vrot.lane.b32.xlu1 %v2516_v16, %s2193_s19 }
 0x39b   : > { %v619_v44 = vpop.xlane.xlu0 %618  ;;  %1010 = vrot.lane.b32.xlu1 %v2521_v18, %s2193_s19 }
 0x39c   : > { %1928 = vrcp.f32 %v619_v44 }
 0x3a6   : > { %v1929_v45 = vpop.eup %1928 }
 0x3a7   : > { %v621_v46 = vmul.f32 %v1929_v45, %v1925_v36 }
 0x3a9   : > { %1750 = vmatmul.mubr.msk.f32.vlgmr.msra.gmra.mrb[2].mxu1 %vm533_vm2, %v621_v46 }
 0x3aa   : > { %1759 = vmatprep.mubr.msk.f32.mxu1 %vm2188_vm0, %v2189_v1 }
 0x40f   : > { %v785_v48 = vpop.xlane.xlu1 %784 }
 0x410   : > { %1930 = vrcp.f32 %v785_v48 }
 0x413   : > { %v789_v49 = vpop.permute.xlu1 %788 }
 0x414   : > { %1758 = vmatpush3.msra.mxu1 %v789_v49 }
 0x415   : > { %1767 = vmatprep.subr.mxu1 %v2189_v1 }
 0x417   : > { %v1013_v55 = vpop.permute.xlu1 %1012 }
 0x41a   : > { %v1931_v50 = vpop.eup %1930 }
 0x41b   : > { %v787_v51 = vmul.f32 %v1931_v50, %v1927_v42  ;;  %v1011_v58 = vpop.permute.xlu1 %1010 }
 0x41d   : > { %1760 = vmatmul.mubr.msk.f32.vlgmr.msra.gmra.mrb[4].mxu1 %vm533_vm2, %v787_v51 }
 0x41e   : > { %1768 = vmatpush3.msra.mxu1 %v529_v52  ;;  %1769 = vmatprep.mubr.msk.f32.mxu1 %vm2188_vm0, %v2189_v1 }
 0x41f   : > { %1777 = vmatprep.subr.mxu1 %v2189_v1 }
 0x47c   : > { %v694_v53 = vpop.f32.mrb[2].mxu1 }
 0x47d   : > { %v1751_v54 = vpop.f32.mrb[3].mxu1  ;;  %1770 = vmatmul.mubr.msk.f32.vlgmr.msra.gmra.mrb[6].mxu1 %vm533_vm2, %v694_v53 }
 0x47e   : > { %1779 = vmatprep.mubr.msk.f32.mxu1 %vm2188_vm0, %v2189_v1 }
 0x4f0   : > { %v860_v56 = vpop.f32.mrb[4].mxu1 }
 0x4f1   : > { %v1761_v57 = vpop.f32.mrb[5].mxu1  ;;  %1765 = vmatmul.mubr.msk.f32.vlgmr.msra.gmra.mrb[6].mxu0 %vm533_vm2, %v860_v56 }
 0x4f2   : > { %1773 = vmatpush3.xpose.msk.msra.mxu0 %vm533_vm2, %v1013_v55  ;;  %1774 = vmatprep.mubr.msk.f32.mxu0 %vm2188_vm0, %v2189_v1 }
 0x4f3   : > { %1782 = vmatprep.subr.mxu0 %v2189_v1 }
 0x4f5   : > { %1775 = vmatmul.mubr.msk.f32.vlgmr.msra.gmra.mrb[8].mxu0 %vm533_vm2, %v1011_v58 }
 0x4f6   : > { %1784 = vmatprep.mubr.msk.f32.mxu0 %vm2188_vm0, %v2189_v1  ;;  %1783 = vmatpush3.msra.mxu0 %v531_v17 }
 0x4f7   : > { %1792 = vmatprep.subr.mxu0 %v2189_v1 }
 0x550   : > { %v1006_v59 = vpop.f32.mrb[6].mxu1 }
 0x551   : > { %v1771_v60 = vpop.f32.mrb[7].mxu1 }
 0x5c4   : > { %v933_v61 = vpop.f32.mrb[6].mxu0 }
 0x5c5   : > { %v1007_v62 = vadd.f32 %v1006_v59, %v933_v61  ;;  %v1766_v63 = vpop.f32.mrb[7].mxu0 }
 0x5c8   : > { %v1084_v0 = vpop.f32.mrb[8].mxu0 }
 0x5c9   : > { %v1088_v2 = vsel %vm528_vm3, %v1084_v0, -1e+30  ;;  %v1776_v3 = vpop.f32.mrb[9].mxu0 }
 0x5ca   : > { %v1089_v4 = vsel %vm533_vm2, %v1088_v2, -inf }
 0x5cb   : > { %1090 = vmax.xlane.f32.xlu0 %v1089_v4 }
 0x5e1   : > { %1100 = vrot.lane.b32.xlu0 %v2516_v16, %s2194_s16 }
 0x5e5   : > { %1252 = vrot.lane.b32.xlu0 %v2516_v16, %s2195_s2 }
 0x5e9   : > { %1250 = vrot.lane.b32.xlu0 %v2521_v18, %s2195_s2 }
 0x658   : > { %v1091_v5 = vpop.xlane.xlu0 %1090 }
 0x659   : > { %v1092_v6 = vsub.f32 %v1088_v2, %v1091_v5 }
 0x65b   : > { %v1093_v7 = vmul.f32 1.442695, %v1092_v6 }
 0x65c   : > { %v1101_v8 = vpop.permute.xlu0 %1100 }
 0x65d   : > { %1932 = vpow2.f32 %v1093_v7  ;;  %1778 = vmatpush3.msra.mxu1 %v1101_v8 }
 0x65e   : > { %1787 = vmatprep.subr.mxu1 %v2189_v1 }
 0x660   : > { %v1253_v13 = vpop.permute.xlu0 %1252 }
 0x664   : > { %v1251_v15 = vpop.permute.xlu0 %1250 }
 0x667   : > { %v1933_v9 = vpop.eup %1932 }
 0x668   : > { %v1095_v10 = vsel %vm533_vm2, %v1933_v9, 0.0 }
 0x669   : > { %1096 = vadd.xlane.f32.xlu1 %v1095_v10 }
 0x6f6   : > { %v1097_v11 = vpop.xlane.xlu1 %1096 }
 0x6f7   : > { %1934 = vrcp.f32 %v1097_v11 }
 0x701   : > { %v1935_v12 = vpop.eup %1934 }
 0x702   : > { %v1099_v14 = vmul.f32 %v1935_v12, %v1933_v9 }
 0x704   : > { %1780 = vmatmul.mubr.msk.f32.vlgmr.msra.gmra.mrb[8].mxu1 %vm533_vm2, %v1099_v14 }
 0x705   : > { %1788 = vmatpush3.xpose.msk.msra.mxu1 %vm533_vm2, %v1253_v13  ;;  %1789 = vmatprep.mubr.msk.f32.mxu1 %vm2188_vm0, %v2189_v1 }
 0x706   : > { %1797 = vmatprep.subr.mxu1 %v2189_v1 }
 0x708   : > { %1790 = vmatmul.mubr.msk.f32.vlgmr.msra.gmra.mrb[10].mxu1 %vm533_vm2, %v1251_v15 }
 0x709   : > { %1799 = vmatprep.mubr.msk.f32.mxu1 %vm2188_vm0, %v2189_v1 }
 0x7d7   : > { %v1172_v18 = vpop.f32.mrb[8].mxu1 }
 0x7d8   : > { %v1781_v19 = vpop.f32.mrb[9].mxu1  ;;  %1785 = vmatmul.mubr.msk.f32.vlgmr.msra.gmra.mrb[10].mxu0 %vm533_vm2, %v1172_v18 }
 0x7d9   : > { %1794 = vmatprep.mubr.msk.f32.mxu0 %vm2188_vm0, %v2189_v1  ;;  %v532_v1 = vld [vmem:[#allocation10 + $0x18] sm:$0xff] }
 0x7da   : > { %1798 = vmatpush3.msra.mxu1 %v532_v1 }
 0x7db   : > { %v1324_v20 = vpop.f32.mrb[10].mxu1 }
 0x7dc   : > { %v1328_v21 = vsel %vm528_vm3, %v1324_v20, -1e+30  ;;  %v1791_v22 = vpop.f32.mrb[11].mxu1 }
 0x7dd   : > { %v1329_v25 = vsel %vm533_vm2, %v1328_v21, -inf }
 0x7de   : > { %1330 = vmax.xlane.f32.xlu0 %v1329_v25 }
 0x86b   : > { %v1331_v26 = vpop.xlane.xlu0 %1330 }
 0x86c   : > { %v1332_v27 = vsub.f32 %v1328_v21, %v1331_v26 }
 0x86e   : > { %v1333_v28 = vmul.f32 1.442695, %v1332_v27 }
 0x870   : > { %1936 = vpow2.f32 %v1333_v28 }
 0x87a   : > { %v1937_v29 = vpop.eup %1936 }
 0x87b   : > { %v1335_v30 = vsel %vm533_vm2, %v1937_v29, 0.0 }
 0x87c   : > { %1336 = vadd.xlane.f32.xlu1 %v1335_v30 }
 0x88d   : > { %1340 = vrot.lane.b32.xlu1 %v2516_v16, %s2196_s13 }
 0x8ab   : > { %v1245_v23 = vpop.f32.mrb[10].mxu0 }
 0x8ac   : > { %v1249_v24 = vadd.f32 %v1245_v23, %v1007_v62  ;;  %v1786_v31 = vpop.f32.mrb[11].mxu0 }
 0x909   : > { %v1337_v32 = vpop.xlane.xlu1 %1336 }
 0x90a   : > { %1938 = vrcp.f32 %v1337_v32 }
 0x90d   : > { %v1341_v33 = vpop.permute.xlu1 %1340 }
 0x90e   : > { %1793 = vmatpush3.msra.mxu0 %v1341_v33 }
 0x914   : > { %v1939_v34 = vpop.eup %1938 }
 0x915   : > { %v1339_v35 = vmul.f32 %v1939_v34, %v1937_v29 }
 0x917   : > { %1795 = vmatmul.mubr.msk.f32.vlgmr.msra.gmra.mrb[12].mxu0 %vm533_vm2, %v1339_v35 }
 0x9ea   : > { %v1412_v36 = vpop.f32.mrb[12].mxu0 }
 0x9eb   : > { %v1796_v37 = vpop.f32.mrb[13].mxu0  ;;  %1800 = vmatmul.mubr.msk.f32.vlgmr.msra.gmra.mrb[12].mxu1 %vm533_vm2, %v1412_v36 }
 0xabe   : > { %v1485_v16 = vpop.f32.mrb[12].mxu1 }
 0xabf   : > { %v1489_v39 = vadd.f32 %v1485_v16, %v1249_v24  ;;  %v1801_v40 = vpop.f32.mrb[13].mxu1 }
 0xac1   : > { %v1497_v41 = vadd.f32 %v1681_v38, %v1489_v39 }
 0xac3   : > { %1498 = vst.msk [vmem:[%s363_s11] sm:$0xff] %vm370_vm1, %v1497_v41 }
 0xac4   : > { %2097 = shalt.err (!%p2094_p5)
}
 0xac5   : > { %s2098_s18 = scalar_lea.hbm %s2612_s7, 128  ;;  %s2102_s19 = scalar_lea.hbm %s2668_s6, 256 }
 0xac6   : > { %p2099_p6 = scmp.ne.s32.totalorder %s2612_s7, %s2098_s18  ;;  %p2103_p12 = scmp.lt.u32.totalorder %s2612_s7, %s2668_s6 }
 0xac7   : > { %p2104_p11 = scmp.lt.u32.totalorder %s2102_s19, %s2098_s18  ;;  %p2106_p0 = scmp.lt.u32.totalorder %s2098_s18, %s2612_s7 }
 0xac8   : > { %p2100_p10 = pnand %p2099_p6, %p2697_p2 }
 0xac9   : > { %p2105_p9 = por %p2104_p11, %p2103_p12 }
 0xaca   : > { %p2101_p7 = pneg %p2100_p10 }
 0xacb   : > { %p2107_p4 = por %p2106_p0, %p2105_p9 }
 0xacd   : > { %p2108_p8 = pnand %p2107_p4, %p2101_p7 }
 0xacf   : > { %2111 = shalt.err (!%p2108_p8)
}
 0xad0   : > { %1830 = dma.vmem_to_hbm [thread:$0]  (%p2697_p2), %s2614_s17, 128, %s2612_s7, %s1500_s9  }
 0xad1 PF: > { %s2698_s13 = sld [smem:[#allocation17_spill]]  ;;  %s2699_s4 = sld [smem:[#allocation18_spill]] }
 0xad2   : > { %p2701_p13 = scmp.ge.s32.totalorder %s2178_s26, 2 }
 0xad7   : > { %s1526_s14 = sand.u32 1, %s2698_s13   ;;  %p2700_p1 = scmp.ne.s32.totalorder %s2699_s4, 0 }
 0xad8   : > { %s1527_s28 = scalar_lea.sflag [#allocation4], %s1526_s14 }
 0xad9   : > { %p1850_p3 = pnand %p2701_p13, %p2700_p1 }
 0xadb   : > { %2153 = dma.done.wait (!%p1850_p3), %s1527_s28, 128  }
 0xadc   : > { %2155 = vsyncadd (!%p1850_p3), %s1527_s28, 4294967168  ;;  %s26_s26 = sadd.s32 1, %s2178_s26   ;;  %s2702_s21 = smov %s2162_s22 }
 0xadd   : > { %p23_p5 = scmp.ge.s32.totalorder %s26_s26, 4   ;;  %s2703_s22 = smov %s2166_s23 }
 0xade   : > { %s2704_s23 = smov %s2403_s15  ;;  %s2705_s24 = smov %s2174_s25 }
 0xadf   : > { %s2706_s25 = smov %s2708_s10  ;;  %25 = sbr.rel (!%p23_p5) target bundleno = 13 (0xd), region = 114 }
 0xae6   :  { %1532 = vsyncpa [#allocation3], 1 }
 0xae7   :  { %1534 = vsyncpa [#allocation3 + $0x1], 1 }
 0xae8   :  { %1535 = vsyncpa [#allocation6], 1 }
 0xae9   :  { %1537 = vsyncpa [#allocation6 + $0x1], 1 }
 0xaea   :  { %1538 = vsyncpa [#allocation9], 1 }
 0xaeb   :  { %1539 = vsyncpa [#allocation4], 1 }
 0xaec   :  { %1541 = vsyncpa [#allocation4 + $0x1], 1 }

</bundles_post_ra>
